<compile_context>
chip_gen: v6e
topology: v6e:2x2x1
jax: 0.10.0
libtpu: 0.0.40
codegen_flags: <defaults>
</compile_context>

<pallas_src>
import functools

import jax
import jax.numpy as jnp
from jax import lax
from jax.experimental import pallas as pl
from jax.experimental.pallas import tpu as pltpu

EPS = 1e-5
LANE = 128


# ----------------------------------------------------------------------------- helpers
def _round_up(n, m):
    return (n + m - 1) // m * m


def _pad2(a, rows, cols, value=0.0):
    r, c = a.shape
    return jnp.pad(a, ((0, rows - r), (0, cols - c)), constant_values=value)


def _pick_tile(n, cap=2048):
    # Largest power-of-two-ish divisor of n (<= cap); fall back to the whole batch.
    for t in (cap, 1024, 512, 256, 128, 64, 32, 16, 8):
        if t <= n and n % t == 0:
            return t
    return n


# ----------------------------------------------------------------------------- kernels
def _bn_scale_shift(sum_ref, sumsq_ref, g_ref, b_ref, inv_n):
    """Fold training-mode BN into per-feature scale/shift (one FMA per element)."""
    mu = sum_ref[...] * inv_n
    var = jnp.maximum(sumsq_ref[...] * inv_n - mu * mu, 0.0)   # clamp cancellation
    scale = g_ref[...] * lax.rsqrt(var + EPS)                  # rsqrt -> EUP
    shift = b_ref[...] - mu * scale
    return scale, shift


def _accum_stats(h, sum_ref, sumsq_ref):
    """Accumulate per-feature sum / sum-of-squares into resident output blocks."""
    @pl.when(pl.program_id(0) == 0)
    def _():
        sum_ref[...] = jnp.zeros_like(sum_ref)
        sumsq_ref[...] = jnp.zeros_like(sumsq_ref)

    sum_ref[...] = sum_ref[...] + jnp.sum(h, axis=0, keepdims=True)
    sumsq_ref[...] = sumsq_ref[...] + jnp.sum(h * h, axis=0, keepdims=True)


def first_layer_kernel(x_ref, w_ref, h_ref, sum_ref, sumsq_ref):
    # layer_1 matmul (bias dropped: cancelled by training-mode BN) + stats of h1.
    h = jnp.dot(x_ref[...].astype(jnp.bfloat16), w_ref[...],
                preferred_element_type=jnp.float32)
    h_ref[...] = h
    _accum_stats(h, sum_ref, sumsq_ref)


def mid_layer_kernel(h_ref, sum_ref, sumsq_ref, g_ref, b_ref, w_ref,
                     oh_ref, osum_ref, osumsq_ref, *, inv_n):
    # BN(prev) -> ReLU -> (Dropout = identity) -> matmul(next) -> stats(next).
    scale, shift = _bn_scale_shift(sum_ref, sumsq_ref, g_ref, b_ref, inv_n)
    a = jnp.maximum(h_ref[...] * scale + shift, 0.0)
    h = jnp.dot(a.astype(jnp.bfloat16), w_ref[...],
                preferred_element_type=jnp.float32)
    oh_ref[...] = h
    _accum_stats(h, osum_ref, osumsq_ref)


def out_layer_kernel(h_ref, sum_ref, sumsq_ref, g_ref, b_ref, w_ref, bo_ref,
                     o_ref, *, inv_n):
    # BN(layer_3) -> ReLU -> (Dropout = identity) -> layer_out (+ bias).
    scale, shift = _bn_scale_shift(sum_ref, sumsq_ref, g_ref, b_ref, inv_n)
    a = jnp.maximum(h_ref[...] * scale + shift, 0.0)
    o_ref[...] = jnp.dot(a.astype(jnp.bfloat16), w_ref[...],
                         preferred_element_type=jnp.float32) + bo_ref[...]


# ----------------------------------------------------------------------------- wrapper
def network_forward(x, params, *, batch_tile=None):
    """x: (N, num_features) f32. params: dict of f32 weights / biases / BN params."""
    N, f_in = x.shape
    num_class = params["wo"].shape[1]
    h1, h2, h3 = params["w1"].shape[1], params["w2"].shape[1], params["w3"].shape[1]
    H1, H2, H3, C = (_round_up(d, LANE) for d in (h1, h2, h3, num_class))

    tn = batch_tile or _pick_tile(N)
    if N % tn:
        tn = N
    grid = (N // tn,)
    inv_n = 1.0 / N

    # ---- pad feature dims to 128 lanes; weights to bf16 (MXU-native inputs).
    # Padded columns are zero -> padded channels stay exactly zero through
    # BN (mu=0, shift=0) and ReLU, and padded weight rows are zero, so the
    # math is unchanged.
    def padw(w, rows, cols):
        return _pad2(w, rows, cols).astype(jnp.bfloat16)

    w1 = padw(params["w1"], f_in, H1)
    w2 = padw(params["w2"], H1, H2)
    w3 = padw(params["w3"], H2, H3)
    wo = padw(params["wo"], H3, C)
    bo = _pad2(params["bo"], 1, C)
    g1 = _pad2(params["g1"], 1, H1, value=1.0)
    g2 = _pad2(params["g2"], 1, H2, value=1.0)
    g3 = _pad2(params["g3"], 1, H3, value=1.0)
    be1 = _pad2(params["be1"], 1, H1)
    be2 = _pad2(params["be2"], 1, H2)
    be3 = _pad2(params["be3"], 1, H3)

    row_spec = lambda feat: pl.BlockSpec((tn, feat), lambda i: (i, 0))
    full_spec = lambda shape: pl.BlockSpec(shape, lambda i: (0, 0))

    cp_acc = pltpu.CompilerParams(dimension_semantics=("arbitrary",),
                                  vmem_limit_bytes=32 * 1024 * 1024)
    cp_par = pltpu.CompilerParams(dimension_semantics=("parallel",),
                                  vmem_limit_bytes=32 * 1024 * 1024)

    def mm_cost(k, n_out):
        return pl.CostEstimate(
            flops=2 * N * k * n_out + 8 * N * n_out,
            transcendentals=n_out,
            bytes_accessed=4 * N * (k + n_out) + 2 * k * n_out + 24 * n_out)

    # ---- layer_1: x @ W1, accumulate stats of h1.
    h1a, s1, ss1 = pl.pallas_call(
        first_layer_kernel,
        grid=grid,
        in_specs=[row_spec(f_in), full_spec((f_in, H1))],
        out_specs=(row_spec(H1), full_spec((1, H1)), full_spec((1, H1))),
        out_shape=(jax.ShapeDtypeStruct((N, H1), jnp.float32),
                   jax.ShapeDtypeStruct((1, H1), jnp.float32),
                   jax.ShapeDtypeStruct((1, H1), jnp.float32)),
        compiler_params=cp_acc,
        cost_estimate=mm_cost(f_in, H1),
    )(x, w1)

    # ---- middle layers: BN(prev)+ReLU -> matmul -> stats.
    def mid_call(h, s, ss, g, be, w, f_prev, f_next):
        return pl.pallas_call(
            functools.partial(mid_layer_kernel, inv_n=inv_n),
            grid=grid,
            in_specs=[row_spec(f_prev), full_spec((1, f_prev)), full_spec((1, f_prev)),
                      full_spec((1, f_prev)), full_spec((1, f_prev)),
                      full_spec((f_prev, f_next))],
            out_specs=(row_spec(f_next), full_spec((1, f_next)), full_spec((1, f_next))),
            out_shape=(jax.ShapeDtypeStruct((N, f_next), jnp.float32),
                       jax.ShapeDtypeStruct((1, f_next), jnp.float32),
                       jax.ShapeDtypeStruct((1, f_next), jnp.float32)),
            compiler_params=cp_acc,
            cost_estimate=mm_cost(f_prev, f_next),
        )(h, s, ss, g, be, w)

    h2a, s2, ss2 = mid_call(h1a, s1, ss1, g1, be1, w2, H1, H2)
    h3a, s3, ss3 = mid_call(h2a, s2, ss2, g2, be2, w3, H2, H3)

    # ---- output layer: BN(layer_3)+ReLU -> layer_out (+bias). Batch-parallel.
    out_p = pl.pallas_call(
        functools.partial(out_layer_kernel, inv_n=inv_n),
        grid=grid,
        in_specs=[row_spec(H3), full_spec((1, H3)), full_spec((1, H3)),
                  full_spec((1, H3)), full_spec((1, H3)),
                  full_spec((H3, C)), full_spec((1, C))],
        out_specs=row_spec(C),
        out_shape=jax.ShapeDtypeStruct((N, C), jnp.float32),
        compiler_params=cp_par,
        cost_estimate=mm_cost(H3, C),
    )(h3a, s3, ss3, g3, be3, wo, bo)

    return out_p[:, :num_class]   # lane-dense store in kernel; slice in wrapper


# ----------------------------------------------------------------------------- params / refs
def init_params(key, num_features, num_class, n_hidden):
    """PyTorch-like nn.Linear init. b1/b2/b3 are generated but only used by the
    f32 reference (they cancel exactly under training-mode BN, so the kernel
    omits them)."""
    h1, h2, h3 = n_hidden, n_hidden // 2, n_hidden // 4
    dims = [(num_features, h1), (h1, h2), (h2, h3), (h3, num_class)]
    names = ["1", "2", "3", "o"]
    params = {}
    for (fan_in, fan_out), name in zip(dims, names):
        key, kw, kb = jax.random.split(key, 3)
        bound = 1.0 / jnp.sqrt(jnp.float32(fan_in))
        params["w" + name] = jax.random.uniform(
            kw, (fan_in, fan_out), jnp.float32, -bound, bound)
        params["b" + name] = jax.random.uniform(
            kb, (1, fan_out), jnp.float32, -bound, bound)
    for dim, name in zip([h1, h2, h3], ["1", "2", "3"]):
        key, kg = jax.random.split(key)
        params["g" + name] = 1.0 + 0.1 * jax.random.normal(kg, (1, dim), jnp.float32)
        params["be" + name] = jnp.zeros((1, dim), jnp.float32)
    return params


def network_forward_ref_f32(x, p):
    """Pure-f32 PyTorch-semantics reference (with pre-BN biases, two-pass var)."""
    def bn_relu(h, g, b):
        mu = h.mean(0, keepdims=True)
        var = ((h - mu) ** 2).mean(0, keepdims=True)
        return jnp.maximum((h - mu) / jnp.sqrt(var + EPS) * g + b, 0.0)
    h = bn_relu(x @ p["w1"] + p["b1"], p["g1"], p["be1"])
    h = bn_relu(h @ p["w2"] + p["b2"], p["g2"], p["be2"])
    h = bn_relu(h @ p["w3"] + p["b3"], p["g3"], p["be3"])
    return h @ p["wo"] + p["bo"]


def network_forward_ref_matched(x, p):
    """Reference mirroring the kernel's numerics (bf16 MXU inputs, one-pass BN,
    pre-BN biases dropped)."""
    def mm(a, w):
        return jnp.dot(a.astype(jnp.bfloat16), w.astype(jnp.bfloat16),
                       preferred_element_type=jnp.float32)
    def bn_relu(h, g, b):
        mu = h.mean(0, keepdims=True)
        var = jnp.maximum((h * h).mean(0, keepdims=True) - mu * mu, 0.0)
        scale = g * lax.rsqrt(var + EPS)
        return jnp.maximum(h * scale + (b - mu * scale), 0.0)
    h = bn_relu(mm(x, p["w1"]), p["g1"], p["be1"])
    h = bn_relu(mm(h, p["w2"]), p["g2"], p["be2"])
    h = bn_relu(mm(h, p["w3"]), p["g3"], p["be3"])
    return mm(h, p["wo"]) + p["bo"]


# ----------------------------------------------------------------------------- main
if __name__ == "__main__":
    num_features, num_class, n_hidden = 32, 4, 64
    batch = 64          # small demo; batch_tile=16 exercises the 4-step grid

    key = jax.random.PRNGKey(0)
    key, kx = jax.random.split(key)
    x = jax.random.normal(kx, (batch, num_features), jnp.float32)
    params = init_params(key, num_features, num_class, n_hidden)

    fwd = jax.jit(functools.partial(network_forward, batch_tile=16))
    out = jax.block_until_ready(fwd(x, params))
    assert out.shape == (batch, num_class)

    # Tight check against a reference with identical numerics.
    ref_m = network_forward_ref_matched(x, params)
    assert jnp.allclose(out, ref_m, atol=2e-3, rtol=2e-3), "mismatch vs matched ref"

    # Loose check against full-f32 PyTorch semantics (covers bf16 matmul error
    # and confirms the pre-BN bias cancellation).
    ref_f = network_forward_ref_f32(x, params)
    assert jnp.allclose(out, ref_f, atol=1e-1, rtol=1e-1), "mismatch vs f32 ref"

    print("KERNEL_OK")
</pallas_src>

<mosaic_0001>
module attributes {stable_mosaic.version = 11 : i64} {
  func.func @first_layer_kernel(%arg0: i32, %arg1: memref<16x32xf32, #tpu.memory_space<vmem>>, %arg2: memref<32x128xbf16, #tpu.memory_space<vmem>>, %arg3: memref<16x128xf32, #tpu.memory_space<vmem>>, %arg4: memref<1x128xf32, #tpu.memory_space<vmem>>, %arg5: memref<1x128xf32, #tpu.memory_space<vmem>>) attributes {dimension_semantics = [#tpu.dimension_semantics<arbitrary>], iteration_bounds = array<i64: 4>, scalar_prefetch = 0 : i64, scratch_operands = 0 : i64, tpu.core_type = #tpu.core_type<tc>, window_params = [{transform_indices = @transform_0, window_bounds = array<i64: 16, 32>}, {pipeline_mode = #tpu.pipeline_mode<synchronous>, transform_indices = @transform_1, window_bounds = array<i64: 32, 128>}, {transform_indices = @transform_2, window_bounds = array<i64: 16, 128>}, {pipeline_mode = #tpu.pipeline_mode<synchronous>, transform_indices = @transform_3, window_bounds = array<i64: 1, 128>}, {pipeline_mode = #tpu.pipeline_mode<synchronous>, transform_indices = @transform_4, window_bounds = array<i64: 1, 128>}]} {
    %c0 = arith.constant 0 : index
    %c0_0 = arith.constant 0 : index
    %0 = vector.load %arg1[%c0, %c0_0] : memref<16x32xf32, #tpu.memory_space<vmem>>, vector<16x32xf32>
    %1 = arith.truncf %0 : vector<16x32xf32> to vector<16x32xbf16>
    %c0_1 = arith.constant 0 : index
    %c0_2 = arith.constant 0 : index
    %2 = vector.load %arg2[%c0_1, %c0_2] : memref<32x128xbf16, #tpu.memory_space<vmem>>, vector<32x128xbf16>
    %cst = arith.constant dense<0.000000e+00> : vector<16x128xf32>
    %3 = tpu.matmul %1, %2, %cst {dimension_numbers = #tpu.dot_dimension_numbers<[1], [0], [0], [1], [0, 0, 1, 1], [], []>} : vector<16x32xbf16>, vector<32x128xbf16>, vector<16x128xf32> -> vector<16x128xf32>
    %c0_3 = arith.constant 0 : index
    %c0_4 = arith.constant 0 : index
    %4 = vector.load %arg3[%c0_3, %c0_4] : memref<16x128xf32, #tpu.memory_space<vmem>>, vector<16x128xf32>
    tpu.vector_store %arg3[%c0_3, %c0_4], %3 {strides = array<i32>} : memref<16x128xf32, #tpu.memory_space<vmem>>, vector<16x128xf32>,
    %c0_i32 = arith.constant 0 : i32
    %5 = arith.cmpi eq, %arg0, %c0_i32 : i32
    %6 = arith.extui %5 : i1 to i32
    %c0_i32_5 = arith.constant 0 : i32
    %7 = arith.cmpi ne, %6, %c0_i32_5 : i32
    scf.if %7 {
      %cst_16 = arith.constant 0.000000e+00 : f32
      %19 = vector.broadcast %cst_16 : f32 to vector<1x128xf32>
      %c0_17 = arith.constant 0 : index
      %c0_18 = arith.constant 0 : index
      %20 = vector.load %arg4[%c0_17, %c0_18] : memref<1x128xf32, #tpu.memory_space<vmem>>, vector<1x128xf32>
      tpu.vector_store %arg4[%c0_17, %c0_18], %19 {strides = array<i32>} : memref<1x128xf32, #tpu.memory_space<vmem>>, vector<1x128xf32>,
      %cst_19 = arith.constant 0.000000e+00 : f32
      %21 = vector.broadcast %cst_19 : f32 to vector<1x128xf32>
      %c0_20 = arith.constant 0 : index
      %c0_21 = arith.constant 0 : index
      %22 = vector.load %arg5[%c0_20, %c0_21] : memref<1x128xf32, #tpu.memory_space<vmem>>, vector<1x128xf32>
      tpu.vector_store %arg5[%c0_20, %c0_21], %21 {strides = array<i32>} : memref<1x128xf32, #tpu.memory_space<vmem>>, vector<1x128xf32>,
    } else {
    }
    %c0_6 = arith.constant 0 : index
    %c0_7 = arith.constant 0 : index
    %8 = vector.load %arg4[%c0_6, %c0_7] : memref<1x128xf32, #tpu.memory_space<vmem>>, vector<1x128xf32>
    %cst_8 = arith.constant dense<0.000000e+00> : vector<128xf32>
    %9 = vector.multi_reduction <add>, %3, %cst_8 [0] : vector<16x128xf32> to vector<128xf32>
    %10 = vector.shape_cast %9 : vector<128xf32> to vector<1x128xf32>
    %11 = arith.addf %8, %10 : vector<1x128xf32>
    %c0_9 = arith.constant 0 : index
    %c0_10 = arith.constant 0 : index
    %12 = vector.load %arg4[%c0_9, %c0_10] : memref<1x128xf32, #tpu.memory_space<vmem>>, vector<1x128xf32>
    tpu.vector_store %arg4[%c0_9, %c0_10], %11 {strides = array<i32>} : memref<1x128xf32, #tpu.memory_space<vmem>>, vector<1x128xf32>,
    %c0_11 = arith.constant 0 : index
    %c0_12 = arith.constant 0 : index
    %13 = vector.load %arg5[%c0_11, %c0_12] : memref<1x128xf32, #tpu.memory_space<vmem>>, vector<1x128xf32>
    %14 = arith.mulf %3, %3 : vector<16x128xf32>
    %cst_13 = arith.constant dense<0.000000e+00> : vector<128xf32>
    %15 = vector.multi_reduction <add>, %14, %cst_13 [0] : vector<16x128xf32> to vector<128xf32>
    %16 = vector.shape_cast %15 : vector<128xf32> to vector<1x128xf32>
    %17 = arith.addf %13, %16 : vector<1x128xf32>
    %c0_14 = arith.constant 0 : index
    %c0_15 = arith.constant 0 : index
    %18 = vector.load %arg5[%c0_14, %c0_15] : memref<1x128xf32, #tpu.memory_space<vmem>>, vector<1x128xf32>
    tpu.vector_store %arg5[%c0_14, %c0_15], %17 {strides = array<i32>} : memref<1x128xf32, #tpu.memory_space<vmem>>, vector<1x128xf32>,
    return
  }
  func.func @transform_0(%arg0: i32) -> (i32, i32) {
    %c0_i32 = arith.constant 0 : i32
    %c0_i32_0 = arith.constant 0 : i32
    return %arg0, %c0_i32 : i32, i32
  }
  func.func @transform_1(%arg0: i32) -> (i32, i32) {
    %c0_i32 = arith.constant 0 : i32
    %c0_i32_0 = arith.constant 0 : i32
    %c0_i32_1 = arith.constant 0 : i32
    return %c0_i32, %c0_i32_0 : i32, i32
  }
  func.func @transform_2(%arg0: i32) -> (i32, i32) {
    %c0_i32 = arith.constant 0 : i32
    %c0_i32_0 = arith.constant 0 : i32
    return %arg0, %c0_i32 : i32, i32
  }
  func.func @transform_3(%arg0: i32) -> (i32, i32) {
    %c0_i32 = arith.constant 0 : i32
    %c0_i32_0 = arith.constant 0 : i32
    %c0_i32_1 = arith.constant 0 : i32
    return %c0_i32, %c0_i32_0 : i32, i32
  }
  func.func @transform_4(%arg0: i32) -> (i32, i32) {
    %c0_i32 = arith.constant 0 : i32
    %c0_i32_0 = arith.constant 0 : i32
    %c0_i32_1 = arith.constant 0 : i32
    return %c0_i32, %c0_i32_0 : i32, i32
  }
}

module attributes {stable_mosaic.version = 11 : i64} {
  func.func @mid_layer_kernel(%arg0: i32, %arg1: memref<16x128xf32, #tpu.memory_space<vmem>>, %arg2: memref<1x128xf32, #tpu.memory_space<vmem>>, %arg3: memref<1x128xf32, #tpu.memory_space<vmem>>, %arg4: memref<1x128xf32, #tpu.memory_space<vmem>>, %arg5: memref<1x128xf32, #tpu.memory_space<vmem>>, %arg6: memref<128x128xbf16, #tpu.memory_space<vmem>>, %arg7: memref<16x128xf32, #tpu.memory_space<vmem>>, %arg8: memref<1x128xf32, #tpu.memory_space<vmem>>, %arg9: memref<1x128xf32, #tpu.memory_space<vmem>>) attributes {dimension_semantics = [#tpu.dimension_semantics<arbitrary>], iteration_bounds = array<i64: 4>, scalar_prefetch = 0 : i64, scratch_operands = 0 : i64, tpu.core_type = #tpu.core_type<tc>, window_params = [{transform_indices = @transform_0, window_bounds = array<i64: 16, 128>}, {pipeline_mode = #tpu.pipeline_mode<synchronous>, transform_indices = @transform_1, window_bounds = array<i64: 1, 128>}, {pipeline_mode = #tpu.pipeline_mode<synchronous>, transform_indices = @transform_2, window_bounds = array<i64: 1, 128>}, {pipeline_mode = #tpu.pipeline_mode<synchronous>, transform_indices = @transform_3, window_bounds = array<i64: 1, 128>}, {pipeline_mode = #tpu.pipeline_mode<synchronous>, transform_indices = @transform_4, window_bounds = array<i64: 1, 128>}, {pipeline_mode = #tpu.pipeline_mode<synchronous>, transform_indices = @transform_5, window_bounds = array<i64: 128, 128>}, {transform_indices = @transform_6, window_bounds = array<i64: 16, 128>}, {pipeline_mode = #tpu.pipeline_mode<synchronous>, transform_indices = @transform_7, window_bounds = array<i64: 1, 128>}, {pipeline_mode = #tpu.pipeline_mode<synchronous>, transform_indices = @transform_8, window_bounds = array<i64: 1, 128>}]} {
    %c0 = arith.constant 0 : index
    %c0_0 = arith.constant 0 : index
    %0 = vector.load %arg2[%c0, %c0_0] : memref<1x128xf32, #tpu.memory_space<vmem>>, vector<1x128xf32>
    %cst = arith.constant 1.562500e-02 : f32
    %1 = vector.broadcast %cst : f32 to vector<1x128xf32>
    %2 = arith.mulf %0, %1 : vector<1x128xf32>
    %c0_1 = arith.constant 0 : index
    %c0_2 = arith.constant 0 : index
    %3 = vector.load %arg3[%c0_1, %c0_2] : memref<1x128xf32, #tpu.memory_space<vmem>>, vector<1x128xf32>
    %cst_3 = arith.constant 1.562500e-02 : f32
    %4 = vector.broadcast %cst_3 : f32 to vector<1x128xf32>
    %5 = arith.mulf %3, %4 : vector<1x128xf32>
    %6 = arith.mulf %2, %2 : vector<1x128xf32>
    %7 = arith.subf %5, %6 : vector<1x128xf32>
    %cst_4 = arith.constant 0.000000e+00 : f32
    %8 = vector.broadcast %cst_4 : f32 to vector<1x128xf32>
    %9 = arith.maximumf %7, %8 : vector<1x128xf32>
    %c0_5 = arith.constant 0 : index
    %c0_6 = arith.constant 0 : index
    %10 = vector.load %arg4[%c0_5, %c0_6] : memref<1x128xf32, #tpu.memory_space<vmem>>, vector<1x128xf32>
    %cst_7 = arith.constant 9.99999974E-6 : f32
    %11 = vector.broadcast %cst_7 : f32 to vector<1x128xf32>
    %12 = arith.addf %9, %11 : vector<1x128xf32>
    %13 = math.rsqrt %12 : vector<1x128xf32>
    %14 = arith.mulf %10, %13 : vector<1x128xf32>
    %c0_8 = arith.constant 0 : index
    %c0_9 = arith.constant 0 : index
    %15 = vector.load %arg5[%c0_8, %c0_9] : memref<1x128xf32, #tpu.memory_space<vmem>>, vector<1x128xf32>
    %16 = arith.mulf %2, %14 : vector<1x128xf32>
    %17 = arith.subf %15, %16 : vector<1x128xf32>
    %c0_10 = arith.constant 0 : index
    %c0_11 = arith.constant 0 : index
    %18 = vector.load %arg1[%c0_10, %c0_11] : memref<16x128xf32, #tpu.memory_space<vmem>>, vector<16x128xf32>
    %19 = vector.broadcast %14 : vector<1x128xf32> to vector<16x128xf32>
    %20 = arith.mulf %18, %19 : vector<16x128xf32>
    %21 = vector.broadcast %17 : vector<1x128xf32> to vector<16x128xf32>
    %22 = arith.addf %20, %21 : vector<16x128xf32>
    %cst_12 = arith.constant 0.000000e+00 : f32
    %23 = vector.broadcast %cst_12 : f32 to vector<16x128xf32>
    %24 = arith.maximumf %22, %23 : vector<16x128xf32>
    %25 = arith.truncf %24 : vector<16x128xf32> to vector<16x128xbf16>
    %c0_13 = arith.constant 0 : index
    %c0_14 = arith.constant 0 : index
    %26 = vector.load %arg6[%c0_13, %c0_14] : memref<128x128xbf16, #tpu.memory_space<vmem>>, vector<128x128xbf16>
    %cst_15 = arith.constant dense<0.000000e+00> : vector<16x128xf32>
    %27 = tpu.matmul %25, %26, %cst_15 {dimension_numbers = #tpu.dot_dimension_numbers<[1], [0], [0], [1], [0, 0, 1, 1], [], []>} : vector<16x128xbf16>, vector<128x128xbf16>, vector<16x128xf32> -> vector<16x128xf32>
    %c0_16 = arith.constant 0 : index
    %c0_17 = arith.constant 0 : index
    %28 = vector.load %arg7[%c0_16, %c0_17] : memref<16x128xf32, #tpu.memory_space<vmem>>, vector<16x128xf32>
    tpu.vector_store %arg7[%c0_16, %c0_17], %27 {strides = array<i32>} : memref<16x128xf32, #tpu.memory_space<vmem>>, vector<16x128xf32>,
    %c0_i32 = arith.constant 0 : i32
    %29 = arith.cmpi eq, %arg0, %c0_i32 : i32
    %30 = arith.extui %29 : i1 to i32
    %c0_i32_18 = arith.constant 0 : i32
    %31 = arith.cmpi ne, %30, %c0_i32_18 : i32
    scf.if %31 {
      %cst_29 = arith.constant 0.000000e+00 : f32
      %43 = vector.broadcast %cst_29 : f32 to vector<1x128xf32>
      %c0_30 = arith.constant 0 : index
      %c0_31 = arith.constant 0 : index
      %44 = vector.load %arg8[%c0_30, %c0_31] : memref<1x128xf32, #tpu.memory_space<vmem>>, vector<1x128xf32>
      tpu.vector_store %arg8[%c0_30, %c0_31], %43 {strides = array<i32>} : memref<1x128xf32, #tpu.memory_space<vmem>>, vector<1x128xf32>,
      %cst_32 = arith.constant 0.000000e+00 : f32
      %45 = vector.broadcast %cst_32 : f32 to vector<1x128xf32>
      %c0_33 = arith.constant 0 : index
      %c0_34 = arith.constant 0 : index
      %46 = vector.load %arg9[%c0_33, %c0_34] : memref<1x128xf32, #tpu.memory_space<vmem>>, vector<1x128xf32>
      tpu.vector_store %arg9[%c0_33, %c0_34], %45 {strides = array<i32>} : memref<1x128xf32, #tpu.memory_space<vmem>>, vector<1x128xf32>,
    } else {
    }
    %c0_19 = arith.constant 0 : index
    %c0_20 = arith.constant 0 : index
    %32 = vector.load %arg8[%c0_19, %c0_20] : memref<1x128xf32, #tpu.memory_space<vmem>>, vector<1x128xf32>
    %cst_21 = arith.constant dense<0.000000e+00> : vector<128xf32>
    %33 = vector.multi_reduction <add>, %27, %cst_21 [0] : vector<16x128xf32> to vector<128xf32>
    %34 = vector.shape_cast %33 : vector<128xf32> to vector<1x128xf32>
    %35 = arith.addf %32, %34 : vector<1x128xf32>
    %c0_22 = arith.constant 0 : index
    %c0_23 = arith.constant 0 : index
    %36 = vector.load %arg8[%c0_22, %c0_23] : memref<1x128xf32, #tpu.memory_space<vmem>>, vector<1x128xf32>
    tpu.vector_store %arg8[%c0_22, %c0_23], %35 {strides = array<i32>} : memref<1x128xf32, #tpu.memory_space<vmem>>, vector<1x128xf32>,
    %c0_24 = arith.constant 0 : index
    %c0_25 = arith.constant 0 : index
    %37 = vector.load %arg9[%c0_24, %c0_25] : memref<1x128xf32, #tpu.memory_space<vmem>>, vector<1x128xf32>
    %38 = arith.mulf %27, %27 : vector<16x128xf32>
    %cst_26 = arith.constant dense<0.000000e+00> : vector<128xf32>
    %39 = vector.multi_reduction <add>, %38, %cst_26 [0] : vector<16x128xf32> to vector<128xf32>
    %40 = vector.shape_cast %39 : vector<128xf32> to vector<1x128xf32>
    %41 = arith.addf %37, %40 : vector<1x128xf32>
    %c0_27 = arith.constant 0 : index
    %c0_28 = arith.constant 0 : index
    %42 = vector.load %arg9[%c0_27, %c0_28] : memref<1x128xf32, #tpu.memory_space<vmem>>, vector<1x128xf32>
    tpu.vector_store %arg9[%c0_27, %c0_28], %41 {strides = array<i32>} : memref<1x128xf32, #tpu.memory_space<vmem>>, vector<1x128xf32>,
    return
  }
  func.func @transform_0(%arg0: i32) -> (i32, i32) {
    %c0_i32 = arith.constant 0 : i32
    %c0_i32_0 = arith.constant 0 : i32
    return %arg0, %c0_i32 : i32, i32
  }
  func.func @transform_1(%arg0: i32) -> (i32, i32) {
    %c0_i32 = arith.constant 0 : i32
    %c0_i32_0 = arith.constant 0 : i32
    %c0_i32_1 = arith.constant 0 : i32
    return %c0_i32, %c0_i32_0 : i32, i32
  }
  func.func @transform_2(%arg0: i32) -> (i32, i32) {
    %c0_i32 = arith.constant 0 : i32
    %c0_i32_0 = arith.constant 0 : i32
    %c0_i32_1 = arith.constant 0 : i32
    return %c0_i32, %c0_i32_0 : i32, i32
  }
  func.func @transform_3(%arg0: i32) -> (i32, i32) {
    %c0_i32 = arith.constant 0 : i32
    %c0_i32_0 = arith.constant 0 : i32
    %c0_i32_1 = arith.constant 0 : i32
    return %c0_i32, %c0_i32_0 : i32, i32
  }
  func.func @transform_4(%arg0: i32) -> (i32, i32) {
    %c0_i32 = arith.constant 0 : i32
    %c0_i32_0 = arith.constant 0 : i32
    %c0_i32_1 = arith.constant 0 : i32
    return %c0_i32, %c0_i32_0 : i32, i32
  }
  func.func @transform_5(%arg0: i32) -> (i32, i32) {
    %c0_i32 = arith.constant 0 : i32
    %c0_i32_0 = arith.constant 0 : i32
    %c0_i32_1 = arith.constant 0 : i32
    return %c0_i32, %c0_i32_0 : i32, i32
  }
  func.func @transform_6(%arg0: i32) -> (i32, i32) {
    %c0_i32 = arith.constant 0 : i32
    %c0_i32_0 = arith.constant 0 : i32
    return %arg0, %c0_i32 : i32, i32
  }
  func.func @transform_7(%arg0: i32) -> (i32, i32) {
    %c0_i32 = arith.constant 0 : i32
    %c0_i32_0 = arith.constant 0 : i32
    %c0_i32_1 = arith.constant 0 : i32
    return %c0_i32, %c0_i32_0 : i32, i32
  }
  func.func @transform_8(%arg0: i32) -> (i32, i32) {
    %c0_i32 = arith.constant 0 : i32
    %c0_i32_0 = arith.constant 0 : i32
    %c0_i32_1 = arith.constant 0 : i32
    return %c0_i32, %c0_i32_0 : i32, i32
  }
}

module attributes {stable_mosaic.version = 11 : i64} {
  func.func @out_layer_kernel(%arg0: i32, %arg1: memref<16x128xf32, #tpu.memory_space<vmem>>, %arg2: memref<1x128xf32, #tpu.memory_space<vmem>>, %arg3: memref<1x128xf32, #tpu.memory_space<vmem>>, %arg4: memref<1x128xf32, #tpu.memory_space<vmem>>, %arg5: memref<1x128xf32, #tpu.memory_space<vmem>>, %arg6: memref<128x128xbf16, #tpu.memory_space<vmem>>, %arg7: memref<1x128xf32, #tpu.memory_space<vmem>>, %arg8: memref<16x128xf32, #tpu.memory_space<vmem>>) attributes {dimension_semantics = [#tpu.dimension_semantics<parallel>], iteration_bounds = array<i64: 4>, scalar_prefetch = 0 : i64, scratch_operands = 0 : i64, tpu.core_type = #tpu.core_type<tc>, window_params = [{transform_indices = @transform_0, window_bounds = array<i64: 16, 128>}, {pipeline_mode = #tpu.pipeline_mode<synchronous>, transform_indices = @transform_1, window_bounds = array<i64: 1, 128>}, {pipeline_mode = #tpu.pipeline_mode<synchronous>, transform_indices = @transform_2, window_bounds = array<i64: 1, 128>}, {pipeline_mode = #tpu.pipeline_mode<synchronous>, transform_indices = @transform_3, window_bounds = array<i64: 1, 128>}, {pipeline_mode = #tpu.pipeline_mode<synchronous>, transform_indices = @transform_4, window_bounds = array<i64: 1, 128>}, {pipeline_mode = #tpu.pipeline_mode<synchronous>, transform_indices = @transform_5, window_bounds = array<i64: 128, 128>}, {pipeline_mode = #tpu.pipeline_mode<synchronous>, transform_indices = @transform_6, window_bounds = array<i64: 1, 128>}, {transform_indices = @transform_7, window_bounds = array<i64: 16, 128>}]} {
    %c0 = arith.constant 0 : index
    %c0_0 = arith.constant 0 : index
    %0 = vector.load %arg2[%c0, %c0_0] : memref<1x128xf32, #tpu.memory_space<vmem>>, vector<1x128xf32>
    %cst = arith.constant 1.562500e-02 : f32
    %1 = vector.broadcast %cst : f32 to vector<1x128xf32>
    %2 = arith.mulf %0, %1 : vector<1x128xf32>
    %c0_1 = arith.constant 0 : index
    %c0_2 = arith.constant 0 : index
    %3 = vector.load %arg3[%c0_1, %c0_2] : memref<1x128xf32, #tpu.memory_space<vmem>>, vector<1x128xf32>
    %cst_3 = arith.constant 1.562500e-02 : f32
    %4 = vector.broadcast %cst_3 : f32 to vector<1x128xf32>
    %5 = arith.mulf %3, %4 : vector<1x128xf32>
    %6 = arith.mulf %2, %2 : vector<1x128xf32>
    %7 = arith.subf %5, %6 : vector<1x128xf32>
    %cst_4 = arith.constant 0.000000e+00 : f32
    %8 = vector.broadcast %cst_4 : f32 to vector<1x128xf32>
    %9 = arith.maximumf %7, %8 : vector<1x128xf32>
    %c0_5 = arith.constant 0 : index
    %c0_6 = arith.constant 0 : index
    %10 = vector.load %arg4[%c0_5, %c0_6] : memref<1x128xf32, #tpu.memory_space<vmem>>, vector<1x128xf32>
    %cst_7 = arith.constant 9.99999974E-6 : f32
    %11 = vector.broadcast %cst_7 : f32 to vector<1x128xf32>
    %12 = arith.addf %9, %11 : vector<1x128xf32>
    %13 = math.rsqrt %12 : vector<1x128xf32>
    %14 = arith.mulf %10, %13 : vector<1x128xf32>
    %c0_8 = arith.constant 0 : index
    %c0_9 = arith.constant 0 : index
    %15 = vector.load %arg5[%c0_8, %c0_9] : memref<1x128xf32, #tpu.memory_space<vmem>>, vector<1x128xf32>
    %16 = arith.mulf %2, %14 : vector<1x128xf32>
    %17 = arith.subf %15, %16 : vector<1x128xf32>
    %c0_10 = arith.constant 0 : index
    %c0_11 = arith.constant 0 : index
    %18 = vector.load %arg1[%c0_10, %c0_11] : memref<16x128xf32, #tpu.memory_space<vmem>>, vector<16x128xf32>
    %19 = vector.broadcast %14 : vector<1x128xf32> to vector<16x128xf32>
    %20 = arith.mulf %18, %19 : vector<16x128xf32>
    %21 = vector.broadcast %17 : vector<1x128xf32> to vector<16x128xf32>
    %22 = arith.addf %20, %21 : vector<16x128xf32>
    %cst_12 = arith.constant 0.000000e+00 : f32
    %23 = vector.broadcast %cst_12 : f32 to vector<16x128xf32>
    %24 = arith.maximumf %22, %23 : vector<16x128xf32>
    %25 = arith.truncf %24 : vector<16x128xf32> to vector<16x128xbf16>
    %c0_13 = arith.constant 0 : index
    %c0_14 = arith.constant 0 : index
    %26 = vector.load %arg6[%c0_13, %c0_14] : memref<128x128xbf16, #tpu.memory_space<vmem>>, vector<128x128xbf16>
    %cst_15 = arith.constant dense<0.000000e+00> : vector<16x128xf32>
    %27 = tpu.matmul %25, %26, %cst_15 {dimension_numbers = #tpu.dot_dimension_numbers<[1], [0], [0], [1], [0, 0, 1, 1], [], []>} : vector<16x128xbf16>, vector<128x128xbf16>, vector<16x128xf32> -> vector<16x128xf32>
    %c0_16 = arith.constant 0 : index
    %c0_17 = arith.constant 0 : index
    %28 = vector.load %arg7[%c0_16, %c0_17] : memref<1x128xf32, #tpu.memory_space<vmem>>, vector<1x128xf32>
    %29 = vector.broadcast %28 : vector<1x128xf32> to vector<16x128xf32>
    %30 = arith.addf %27, %29 : vector<16x128xf32>
    %c0_18 = arith.constant 0 : index
    %c0_19 = arith.constant 0 : index
    %31 = vector.load %arg8[%c0_18, %c0_19] : memref<16x128xf32, #tpu.memory_space<vmem>>, vector<16x128xf32>
    tpu.vector_store %arg8[%c0_18, %c0_19], %30 {strides = array<i32>} : memref<16x128xf32, #tpu.memory_space<vmem>>, vector<16x128xf32>,
    return
  }
  func.func @transform_0(%arg0: i32) -> (i32, i32) {
    %c0_i32 = arith.constant 0 : i32
    %c0_i32_0 = arith.constant 0 : i32
    return %arg0, %c0_i32 : i32, i32
  }
  func.func @transform_1(%arg0: i32) -> (i32, i32) {
    %c0_i32 = arith.constant 0 : i32
    %c0_i32_0 = arith.constant 0 : i32
    %c0_i32_1 = arith.constant 0 : i32
    return %c0_i32, %c0_i32_0 : i32, i32
  }
  func.func @transform_2(%arg0: i32) -> (i32, i32) {
    %c0_i32 = arith.constant 0 : i32
    %c0_i32_0 = arith.constant 0 : i32
    %c0_i32_1 = arith.constant 0 : i32
    return %c0_i32, %c0_i32_0 : i32, i32
  }
  func.func @transform_3(%arg0: i32) -> (i32, i32) {
    %c0_i32 = arith.constant 0 : i32
    %c0_i32_0 = arith.constant 0 : i32
    %c0_i32_1 = arith.constant 0 : i32
    return %c0_i32, %c0_i32_0 : i32, i32
  }
  func.func @transform_4(%arg0: i32) -> (i32, i32) {
    %c0_i32 = arith.constant 0 : i32
    %c0_i32_0 = arith.constant 0 : i32
    %c0_i32_1 = arith.constant 0 : i32
    return %c0_i32, %c0_i32_0 : i32, i32
  }
  func.func @transform_5(%arg0: i32) -> (i32, i32) {
    %c0_i32 = arith.constant 0 : i32
    %c0_i32_0 = arith.constant 0 : i32
    %c0_i32_1 = arith.constant 0 : i32
    return %c0_i32, %c0_i32_0 : i32, i32
  }
  func.func @transform_6(%arg0: i32) -> (i32, i32) {
    %c0_i32 = arith.constant 0 : i32
    %c0_i32_0 = arith.constant 0 : i32
    %c0_i32_1 = arith.constant 0 : i32
    return %c0_i32, %c0_i32_0 : i32, i32
  }
  func.func @transform_7(%arg0: i32) -> (i32, i32) {
    %c0_i32 = arith.constant 0 : i32
    %c0_i32_0 = arith.constant 0 : i32
    return %arg0, %c0_i32 : i32, i32
  }
}

</mosaic_0001>

<bundles_post_ra>
// kernel: network_forward.4
= control target key start
LH: loop header
LB: loop body
LE: loop exit
PB: predicated region body
PF: predicated region fallthrough
CT: control target
= control target key end

     0   :  { %s434_s15 = smov 0   ;;  %s479_s0 = inlined_call_operand.vmem [shape: f32[64,32], index: 0, kind: input, shape index: {}]   ;;  %s480_s1 = inlined_call_operand.vmem [shape: bf16[32,128], index: 1, kind: input, shape index: {}]   ;;  %s481_s2 = inlined_call_operand.vmem [shape: f32[64,128], index: 2, kind: output, shape index: {0}]   ;;  %s482_s3 = inlined_call_operand.vmem [shape: f32[1,128], index: 3, kind: output, shape index: {1}]   ;;  %s483_s4 = inlined_call_operand.vmem [shape: f32[1,128], index: 4, kind: output, shape index: {2}]  }
   0x1 LB: > { %s359_s16 = sadd.s32 4294967295, %s404_s15   ;;  %p363_p0 = scmp.ge.s32.totalorder %s404_s15, 1  ;;  %s404_s15 = sphi %s434_s15, %s15_s15  }
   0x2   : > { %p158_p1 = scmp.lt.s32.totalorder %s404_s15, 5 }
   0x4   : > { %p159_p2 = pnand %p363_p0, %p158_p1 }
   0x5   : > { %s364_s21 = sshll.u32 (!%p159_p2), %s359_s16, 1  ;;  %p371_p4 = scmp.ne.s32.totalorder (!%p159_p2), %s359_s16, 0 }
   0x6   : > { %162 = sbr.rel (%p159_p2) target bundleno = 240 (0xf0), region = 28  ;;  %p185_p3 = scmp.lt.s32.totalorder (!%p159_p2), %s364_s21, 7 }
   0xb   : > { %v396_v0 = vld [vmem:[%s480_s1 + $0x8] sm:$0xff]   ;;  %v406_v1 = vmov 0.0   ;;  %v397_v2 = vld [vmem:[%s480_s1] sm:$0xff]   ;;  %vm407_vm0 = vmmov 0   ;;  %s485_s21 = smov (!%p185_p3, %s364_s21), 7  ;;  %vm216_vm1 = vcmask 261120  }
   0xc   : > { %377 = vmatprep.subr.bf16.mxu0 %v406_v1  ;;  %381 = vmatprep.mubr.msk.bf16.mxu0 %vm407_vm0, %v406_v1  ;;  %s365_s22 = sshll.u32 %s485_s21, 3 }
   0xd   : > { %378 = vmatpush3.bf16.msra.mxu0 %v396_v0  ;;  %s188_s25 = scalar_lea.vmem %s479_s0, %s365_s22  ;;  %s194_s28 = scalar_lea.vmem %s481_s2, %s365_s22 }
   0xe   : > { %379 = vmatprep.subr.bf16.mxu0 %v406_v1  ;;  %v197_v3 = vld [vmem:[%s188_s25] sm:$0xff]  ;;  %v198_v4 = vld [vmem:[%s188_s25 + $0x8] sm:$0xff] }
   0xf   : > { %v199_v5 = vpack.c.bf16 %v198_v4, %v197_v3 }
  0x11   : > { %380 = vmatpush3.bf16.msra.mxu0 %v397_v2 }
  0x14   : > { %382 = vmatmul.mubr.msk.bf16.vlgmr.msra.gmra.mxu0 %vm216_vm1, %v199_v5 }
  0xd4   : > { %v254_v6 = vpop.f32.mrf.mxu0 }
  0xd5   : > { %261 = vst [vmem:[%s194_s28] sm:$0xff] %v254_v6 }
  0xd6   : > { %v383_v7 = vpop.f32.mrf.mxu0  ;;  %266 = sbr.rel (%p371_p4) target bundleno = 221 (0xdd), region = 32 }
  0xd8   : > { %v257_v8 = vpop.f32.mrf.mxu0 }
  0xd9   : > { %262 = vst [vmem:[%s194_s28 + $0x8] sm:$0xff] %v257_v8 }
  0xda   : > { %v384_v9 = vpop.f32.mrf.mxu0 }
  0xdb   : > { %v408_v10 = vmov 0.0  }
  0xdc   : > { %267 = vst [vmem:[%s482_s3] sm:$0x1] %v408_v10  ;;  %268 = vst [vmem:[%s483_s4] sm:$0x1] %v408_v10 }
  0xdd PF: > { %v270_v11 = vadd.f32 %v257_v8, %v254_v6  ;;  %v280_v12 = vmul.f32 %v254_v6, %v254_v6  ;;  %v281_v13 = vmul.f32 %v257_v8, %v257_v8 }
  0xdf   : > { %v271_v14 = vrot.slane %v270_v11, 4  ;;  %v282_v15 = vadd.f32 %v281_v13, %v280_v12 }
  0xe1   : > { %v272_v16 = vadd.f32 %v271_v14, %v270_v11  ;;  %v283_v17 = vrot.slane %v282_v15, 4 }
  0xe3   : > { %v273_v18 = vrot.slane %v272_v16, 2  ;;  %v284_v19 = vadd.f32 %v283_v17, %v282_v15  ;;  %v269_v24 = vld [vmem:[%s482_s3] sm:$0x1] }
  0xe4   : > { %v279_v27 = vld [vmem:[%s483_s4] sm:$0x1] }
  0xe5   : > { %v274_v20 = vadd.f32 %v273_v18, %v272_v16  ;;  %v285_v21 = vrot.slane %v284_v19, 2 }
  0xe7   : > { %v275_v22 = vrot.slane %v274_v20, 1  ;;  %v286_v23 = vadd.f32 %v285_v21, %v284_v19 }
  0xe9   : > { %v276_v25 = vadd.f32 %v275_v22, %v274_v20  ;;  %v287_v26 = vrot.slane %v286_v23, 1 }
  0xeb   : > { %v277_v28 = vadd.f32 %v276_v25, %v269_v24  ;;  %v288_v29 = vadd.f32 %v287_v26, %v286_v23 }
  0xed   : > { %278 = vst [vmem:[%s482_s3] sm:$0x1] %v277_v28  ;;  %v289_v30 = vadd.f32 %v288_v29, %v279_v27 }
  0xef   : > { %290 = vst [vmem:[%s483_s4] sm:$0x1] %v289_v30 }
  0xf0 PF: > { %s15_s15 = sadd.s32 1, %s404_s15  }
  0xf1   : > { %p12_p5 = scmp.ge.s32.totalorder %s15_s15, 6  }
  0xf3   :  { %14 = sbr.rel (!%p12_p5) target bundleno = 1 (0x1), region = 78 }

// kernel: network_forward.5
= control target key start
LH: loop header
LB: loop body
LE: loop exit
PB: predicated region body
PF: predicated region fallthrough
CT: control target
= control target key end

     0   :  { %s669_s27 = smov 0   ;;  %s744_s0 = inlined_call_operand.vmem [shape: f32[64,128], index: 0, kind: input, shape index: {}]   ;;  %s745_s1 = inlined_call_operand.vmem [shape: f32[1,128], index: 1, kind: input, shape index: {}]   ;;  %s746_s2 = inlined_call_operand.vmem [shape: f32[1,128], index: 2, kind: input, shape index: {}]   ;;  %s747_s3 = inlined_call_operand.vmem [shape: f32[1,128], index: 3, kind: input, shape index: {}]   ;;  %s748_s4 = inlined_call_operand.vmem [shape: f32[1,128], index: 4, kind: input, shape index: {}]   ;;  %s749_s5 = inlined_call_operand.vmem [shape: bf16[128,128], index: 5, kind: input, shape index: {}]   ;;  %s750_s6 = inlined_call_operand.vmem [shape: f32[64,128], index: 6, kind: output, shape index: {0}]   ;;  %s751_s7 = inlined_call_operand.vmem [shape: f32[1,128], index: 7, kind: output, shape index: {1}]   ;;  %s752_s8 = inlined_call_operand.vmem [shape: f32[1,128], index: 8, kind: output, shape index: {2}]  }
   0x1 LB: > { %s543_s28 = sadd.s32 4294967295, %s619_s27   ;;  %p547_p0 = scmp.ge.s32.totalorder %s619_s27, 1  ;;  %s619_s27 = sphi %s669_s27, %s19_s27  }
   0x2   : > { %p258_p1 = scmp.lt.s32.totalorder %s619_s27, 5 }
   0x4   : > { %p259_p2 = pnand %p547_p0, %p258_p1 }
   0x5   : > { %s548_s21 = sshll.u32 (!%p259_p2), %s543_s28, 1  ;;  %p560_p4 = scmp.ne.s32.totalorder (!%p259_p2), %s543_s28, 0 }
   0x6   : > { %262 = sbr.rel (%p259_p2) target bundleno = 271 (0x10f), region = 44  ;;  %p293_p3 = scmp.lt.s32.totalorder (!%p259_p2), %s548_s21, 7 }
   0xb   : > { %v603_v0 = vld [vmem:[%s749_s5 + $0x38] sm:$0xff]   ;;  %v621_v1 = vmov 0.0   ;;  %v604_v2 = vld [vmem:[%s749_s5 + $0x30] sm:$0xff]   ;;  %vm622_vm0 = vmmov 0   ;;  %v605_v3 = vld [vmem:[%s749_s5 + $0x28] sm:$0xff]   ;;  %v322_v16 = vlaneseq  ;;  %s754_s21 = smov (!%p293_p3, %s548_s21), 7 }
   0xc   : > { %572 = vmatprep.subr.bf16.mxu0 %v621_v1  ;;  %588 = vmatprep.mubr.msk.bf16.mxu0 %vm622_vm0, %v621_v1  ;;  %v305_v4 = vld [vmem:[%s745_s1] sm:$0x1]  ;;  %v607_v11 = vld [vmem:[%s749_s5 + $0x18] sm:$0xff]   ;;  %v608_v14 = vld [vmem:[%s749_s5 + $0x10] sm:$0xff]   ;;  %s549_s30 = sshll.u32 %s754_s21, 3 }
   0xd   : > { %573 = vmatpush3.bf16.msra.mxu0 %v603_v0  ;;  %v307_v5 = vld [vmem:[%s746_s2] sm:$0x1]  ;;  %v306_v6 = vmul.f32 0.015625, %v305_v4  ;;  %v609_v15 = vld [vmem:[%s749_s5 + $0x8] sm:$0xff]   ;;  %v323_v18 = vshrl.u32 %v322_v16, 7  ;;  %s296_s13 = scalar_lea.vmem %s744_s0, %s549_s30  ;;  %s302_s18 = scalar_lea.vmem %s750_s6, %s549_s30 }
   0xe   : > { %574 = vmatprep.subr.bf16.mxu0 %v621_v1  ;;  %v308_v7 = vmul.f32 0.015625, %v307_v5  ;;  %v606_v8 = vld [vmem:[%s749_s5 + $0x20] sm:$0xff]   ;;  %v320_v25 = vld [vmem:[%s296_s13 + $0x8] sm:$0xff] }
   0xf   : > { %v309_v9 = vmul.f32 %v306_v6, %v306_v6  ;;  %v610_v17 = vld [vmem:[%s749_s5] sm:$0xff]   ;;  %v324_v20 = vsub.s32 0, %v323_v18 }
  0x10   : > { %v312_v19 = vld [vmem:[%s747_s3] sm:$0x1] }
  0x11   : > { %575 = vmatpush3.bf16.msra.mxu0 %v604_v2  ;;  %v310_v10 = vsub.f32 %v308_v7, %v309_v9  ;;  %v316_v23 = vld [vmem:[%s748_s4] sm:$0x1] }
  0x12   : > { %576 = vmatprep.subr.bf16.mxu0 %v621_v1  ;;  %v319_v24 = vld [vmem:[%s296_s13] sm:$0xff] }
  0x13   : > { %v311_v12 = vmax.f32 %v310_v10, 0.0 }
  0x15   : > { %577 = vmatpush3.bf16.msra.mxu0 %v605_v3  ;;  %v313_v13 = vadd.f32 1e-05, %v311_v12 }
  0x16   : > { %578 = vmatprep.subr.bf16.mxu0 %v621_v1 }
  0x17   : > { %611 = vrsqrt.f32 %v313_v13 }
  0x19   : > { %579 = vmatpush3.bf16.msra.mxu0 %v606_v8 }
  0x1a   : > { %580 = vmatprep.subr.bf16.mxu0 %v621_v1 }
  0x1d   : > { %581 = vmatpush3.bf16.msra.mxu0 %v607_v11 }
  0x1e   : > { %582 = vmatprep.subr.bf16.mxu0 %v621_v1 }
  0x21   : > { %583 = vmatpush3.bf16.msra.mxu0 %v608_v14 }
  0x22   : > { %584 = vmatprep.subr.bf16.mxu0 %v621_v1 }
  0x24   : > { %v612_v21 = vpop.eup %611 }
  0x25   : > { %585 = vmatpush3.bf16.msra.mxu0 %v609_v15  ;;  %v315_v22 = vmul.f32 %v612_v21, %v312_v19 }
  0x26   : > { %586 = vmatprep.subr.bf16.mxu0 %v621_v1 }
  0x27   : > { %v317_v26 = vmul.f32 %v315_v22, %v306_v6  ;;  %v325_v27 = vrot.slane %v315_v22, %v324_v20 }
  0x29   : > { %587 = vmatpush3.bf16.msra.mxu0 %v610_v17  ;;  %v318_v28 = vsub.f32 %v316_v23, %v317_v26  ;;  %v327_v29 = vmul.f32 %v325_v27, %v319_v24  ;;  %v328_v30 = vmul.f32 %v325_v27, %v320_v25 }
  0x2b   : > { %v333_v31 = vrot.slane %v318_v28, %v324_v20 }
  0x2d   : > { %v335_v32 = vadd.f32 %v333_v31, %v327_v29  ;;  %v336_v33 = vadd.f32 %v333_v31, %v328_v30 }
  0x2f   : > { %v337_v34 = vmax.f32 %v335_v32, 0.0  ;;  %v338_v35 = vmax.f32 %v336_v33, 0.0 }
  0x31   : > { %v339_v36 = vpack.c.bf16 %v338_v35, %v337_v34 }
  0x33   : > { %589 = vmatmul.mubr.bf16.vlgmr.msra.gmra.mxu0 %v339_v36 }
  0xf3   : > { %v438_v37 = vpop.f32.mrf.mxu0 }
  0xf4   : > { %445 = vst [vmem:[%s302_s18] sm:$0xff] %v438_v37 }
  0xf5   : > { %v590_v38 = vpop.f32.mrf.mxu0  ;;  %450 = sbr.rel (%p560_p4) target bundleno = 252 (0xfc), region = 48 }
  0xf7   : > { %v441_v39 = vpop.f32.mrf.mxu0 }
  0xf8   : > { %446 = vst [vmem:[%s302_s18 + $0x8] sm:$0xff] %v441_v39 }
  0xf9   : > { %v591_v40 = vpop.f32.mrf.mxu0 }
  0xfa   : > { %v623_v41 = vmov 0.0  }
  0xfb   : > { %451 = vst [vmem:[%s751_s7] sm:$0x1] %v623_v41  ;;  %452 = vst [vmem:[%s752_s8] sm:$0x1] %v623_v41 }
  0xfc PF: > { %v454_v42 = vadd.f32 %v441_v39, %v438_v37  ;;  %v464_v43 = vmul.f32 %v438_v37, %v438_v37  ;;  %v465_v44 = vmul.f32 %v441_v39, %v441_v39 }
  0xfe   : > { %v455_v45 = vrot.slane %v454_v42, 4  ;;  %v466_v46 = vadd.f32 %v465_v44, %v464_v43 }
 0x100   : > { %v456_v47 = vadd.f32 %v455_v45, %v454_v42  ;;  %v467_v48 = vrot.slane %v466_v46, 4 }
 0x102   : > { %v457_v49 = vrot.slane %v456_v47, 2  ;;  %v468_v50 = vadd.f32 %v467_v48, %v466_v46  ;;  %v453_v55 = vld [vmem:[%s751_s7] sm:$0x1] }
 0x103   : > { %v463_v58 = vld [vmem:[%s752_s8] sm:$0x1] }
 0x104   : > { %v458_v51 = vadd.f32 %v457_v49, %v456_v47  ;;  %v469_v52 = vrot.slane %v468_v50, 2 }
 0x106   : > { %v459_v53 = vrot.slane %v458_v51, 1  ;;  %v470_v54 = vadd.f32 %v469_v52, %v468_v50 }
 0x108   : > { %v460_v56 = vadd.f32 %v459_v53, %v458_v51  ;;  %v471_v57 = vrot.slane %v470_v54, 1 }
 0x10a   : > { %v461_v59 = vadd.f32 %v460_v56, %v453_v55  ;;  %v472_v60 = vadd.f32 %v471_v57, %v470_v54 }
 0x10c   : > { %462 = vst [vmem:[%s751_s7] sm:$0x1] %v461_v59  ;;  %v473_v61 = vadd.f32 %v472_v60, %v463_v58 }
 0x10e   : > { %474 = vst [vmem:[%s752_s8] sm:$0x1] %v473_v61 }
 0x10f PF: > { %s19_s27 = sadd.s32 1, %s619_s27  }
 0x110   : > { %p16_p5 = scmp.ge.s32.totalorder %s19_s27, 6  }
 0x112   :  { %18 = sbr.rel (!%p16_p5) target bundleno = 1 (0x1), region = 94 }

// kernel: network_forward.7
= control target key start
LH: loop header
LB: loop body
LE: loop exit
PB: predicated region body
PF: predicated region fallthrough
CT: control target
= control target key end

     0   :  { %s607_s24 = smov 0   ;;  %s666_s0 = inlined_call_operand.vmem [shape: f32[64,128], index: 0, kind: input, shape index: {}]   ;;  %s667_s1 = inlined_call_operand.vmem [shape: f32[1,128], index: 1, kind: input, shape index: {}]   ;;  %s668_s2 = inlined_call_operand.vmem [shape: f32[1,128], index: 2, kind: input, shape index: {}]   ;;  %s669_s3 = inlined_call_operand.vmem [shape: f32[1,128], index: 3, kind: input, shape index: {}]   ;;  %s670_s4 = inlined_call_operand.vmem [shape: f32[1,128], index: 4, kind: input, shape index: {}]   ;;  %s671_s5 = inlined_call_operand.vmem [shape: bf16[128,128], index: 5, kind: input, shape index: {}]   ;;  %s672_s6 = inlined_call_operand.vmem [shape: f32[1,128], index: 6, kind: input, shape index: {}]   ;;  %s673_s7 = inlined_call_operand.vmem [shape: f32[64,128], index: 7, kind: output, shape index: {}]  }
   0x1 LB: > { %s488_s25 = sadd.s32 4294967295, %s563_s24   ;;  %p492_p0 = scmp.ge.s32.totalorder %s563_s24, 1  ;;  %s563_s24 = sphi %s607_s24, %s17_s24  }
   0x2   : > { %p238_p1 = scmp.lt.s32.totalorder %s563_s24, 5 }
   0x4   : > { %p239_p2 = pnand %p492_p0, %p238_p1 }
   0x5   : > { %s493_s17 = sshll.u32 (!%p239_p2), %s488_s25, 1 }
   0x6   : > { %242 = sbr.rel (%p239_p2) target bundleno = 251 (0xfb), region = 48  ;;  %p271_p3 = scmp.lt.s32.totalorder (!%p239_p2), %s493_s17, 7 }
   0xb   : > { %v547_v0 = vld [vmem:[%s671_s5 + $0x38] sm:$0xff]   ;;  %v565_v1 = vmov 0.0   ;;  %v548_v2 = vld [vmem:[%s671_s5 + $0x30] sm:$0xff]   ;;  %vm566_vm0 = vmmov 0   ;;  %v549_v3 = vld [vmem:[%s671_s5 + $0x28] sm:$0xff]   ;;  %v300_v16 = vlaneseq  ;;  %s675_s17 = smov (!%p271_p3, %s493_s17), 7 }
   0xc   : > { %517 = vmatprep.subr.bf16.mxu0 %v565_v1  ;;  %533 = vmatprep.mubr.msk.bf16.mxu0 %vm566_vm0, %v565_v1  ;;  %v283_v4 = vld [vmem:[%s667_s1] sm:$0x1]  ;;  %v551_v11 = vld [vmem:[%s671_s5 + $0x18] sm:$0xff]   ;;  %v552_v14 = vld [vmem:[%s671_s5 + $0x10] sm:$0xff]   ;;  %s494_s25 = sshll.u32 %s675_s17, 3 }
   0xd   : > { %518 = vmatpush3.bf16.msra.mxu0 %v547_v0  ;;  %v285_v5 = vld [vmem:[%s668_s2] sm:$0x1]  ;;  %v284_v6 = vmul.f32 0.015625, %v283_v4  ;;  %v553_v15 = vld [vmem:[%s671_s5 + $0x8] sm:$0xff]   ;;  %v301_v18 = vshrl.u32 %v300_v16, 7  ;;  %s274_s30 = scalar_lea.vmem %s666_s0, %s494_s25  ;;  %s280_s14 = scalar_lea.vmem %s673_s7, %s494_s25 }
   0xe   : > { %519 = vmatprep.subr.bf16.mxu0 %v565_v1  ;;  %v286_v7 = vmul.f32 0.015625, %v285_v5  ;;  %v550_v8 = vld [vmem:[%s671_s5 + $0x20] sm:$0xff]   ;;  %v298_v25 = vld [vmem:[%s274_s30 + $0x8] sm:$0xff] }
   0xf   : > { %v287_v9 = vmul.f32 %v284_v6, %v284_v6  ;;  %v554_v17 = vld [vmem:[%s671_s5] sm:$0xff]   ;;  %v302_v20 = vsub.s32 0, %v301_v18 }
  0x10   : > { %v290_v19 = vld [vmem:[%s669_s3] sm:$0x1] }
  0x11   : > { %520 = vmatpush3.bf16.msra.mxu0 %v548_v2  ;;  %v288_v10 = vsub.f32 %v286_v7, %v287_v9  ;;  %v294_v23 = vld [vmem:[%s670_s4] sm:$0x1] }
  0x12   : > { %521 = vmatprep.subr.bf16.mxu0 %v565_v1  ;;  %v297_v24 = vld [vmem:[%s274_s30] sm:$0xff] }
  0x13   : > { %v289_v12 = vmax.f32 %v288_v10, 0.0  ;;  %v497_v37 = vld [vmem:[%s672_s6] ss:$0 sm:$0xff] }
  0x15   : > { %522 = vmatpush3.bf16.msra.mxu0 %v549_v3  ;;  %v291_v13 = vadd.f32 1e-05, %v289_v12 }
  0x16   : > { %523 = vmatprep.subr.bf16.mxu0 %v565_v1 }
  0x17   : > { %555 = vrsqrt.f32 %v291_v13 }
  0x19   : > { %524 = vmatpush3.bf16.msra.mxu0 %v550_v8 }
  0x1a   : > { %525 = vmatprep.subr.bf16.mxu0 %v565_v1 }
  0x1d   : > { %526 = vmatpush3.bf16.msra.mxu0 %v551_v11 }
  0x1e   : > { %527 = vmatprep.subr.bf16.mxu0 %v565_v1 }
  0x21   : > { %528 = vmatpush3.bf16.msra.mxu0 %v552_v14 }
  0x22   : > { %529 = vmatprep.subr.bf16.mxu0 %v565_v1 }
  0x24   : > { %v556_v21 = vpop.eup %555 }
  0x25   : > { %530 = vmatpush3.bf16.msra.mxu0 %v553_v15  ;;  %v293_v22 = vmul.f32 %v556_v21, %v290_v19 }
  0x26   : > { %531 = vmatprep.subr.bf16.mxu0 %v565_v1 }
  0x27   : > { %v295_v26 = vmul.f32 %v293_v22, %v284_v6  ;;  %v303_v27 = vrot.slane %v293_v22, %v302_v20 }
  0x29   : > { %532 = vmatpush3.bf16.msra.mxu0 %v554_v17  ;;  %v296_v28 = vsub.f32 %v294_v23, %v295_v26  ;;  %v305_v29 = vmul.f32 %v303_v27, %v297_v24  ;;  %v306_v30 = vmul.f32 %v303_v27, %v298_v25 }
  0x2b   : > { %v311_v31 = vrot.slane %v296_v28, %v302_v20 }
  0x2d   : > { %v313_v32 = vadd.f32 %v311_v31, %v305_v29  ;;  %v314_v33 = vadd.f32 %v311_v31, %v306_v30 }
  0x2f   : > { %v315_v34 = vmax.f32 %v313_v32, 0.0  ;;  %v316_v35 = vmax.f32 %v314_v33, 0.0 }
  0x31   : > { %v317_v36 = vpack.c.bf16 %v316_v35, %v315_v34 }
  0x33   : > { %534 = vmatmul.mubr.bf16.vlgmr.msra.gmra.mxu0 %v317_v36 }
  0xf3   : > { %v423_v38 = vpop.f32.mrf.mxu0 }
  0xf4   : > { %v424_v39 = vadd.f32 %v497_v37, %v423_v38 }
  0xf5   : > { %v535_v40 = vpop.f32.mrf.mxu0 }
  0xf6   : > { %430 = vst [vmem:[%s280_s14] sm:$0xff] %v424_v39 }
  0xf7   : > { %v426_v41 = vpop.f32.mrf.mxu0 }
  0xf8   : > { %v427_v42 = vadd.f32 %v497_v37, %v426_v41 }
  0xf9   : > { %v536_v43 = vpop.f32.mrf.mxu0 }
  0xfa   : > { %431 = vst [vmem:[%s280_s14 + $0x8] sm:$0xff] %v427_v42 }
  0xfb PF: > { %s17_s24 = sadd.s32 1, %s563_s24  }
  0xfc   : > { %p14_p4 = scmp.ge.s32.totalorder %s17_s24, 6  }
  0xfe   :  { %16 = sbr.rel (!%p14_p4) target bundleno = 1 (0x1), region = 78 }

</bundles_post_ra>
